<compile_context>
chip_gen: v7x
topology: tpu7x:2x2x1
jax: 0.10.0
libtpu: 0.0.40
codegen_flags: <defaults>
</compile_context>

<pallas_src>
import jax
import jax.numpy as jnp
from jax import lax
from jax.experimental import pallas as pl
from jax.experimental.pallas import tpu as pltpu

LANES = 128


def _round_up(x, m):
    return -(-x // m) * m


def _num_tensorcores():
    # One accumulator shard per TensorCore.  "lite" chips (v5e/v6e) have a
    # single TC per device; megacore chips (v4/v5p/v7x) have two.  Guessing 2
    # on unknown chips is harmless now that there is no shard round-up
    # padding (just one extra, nearly-free grid dimension).
    # TODO(synk): on v7x, verify in xprof that the "parallel" shard axis is
    # really split across both TensorCores; if not, switch that axis to
    # pltpu.CORE_PARALLEL (or pl.core_map over create_tensorcore_mesh).
    try:
        kind = jax.devices()[0].device_kind.lower()
    except Exception:
        return 1
    if "lite" in kind or "v5e" in kind or "v6e" in kind:
        return 1
    return 2


def _make_kernel(blk, chunk, blocks_per_shard, num_blocks, valid_last):
    groups = blk // chunk

    def kernel(p_ref, t_ref, o_ref):
        # o_ref is the resident (8, LANES) f32 accumulator for this shard;
        # its block index depends only on the shard axis, so it stays in
        # VMEM across the whole streaming axis.
        @pl.when(pl.program_id(1) == 0)
        def _():
            o_ref[...] = jnp.zeros_like(o_ref)

        blk_idx = pl.program_id(0) * blocks_per_shard + pl.program_id(1)

        def block_partial_sum(valid):
            # Stream the (blk, LANES) VMEM block in register-resident chunks
            # (load -> VPU -> accumulate): bounds live ranges to a handful of
            # vregs, no (blk, LANES) f32 temporary.  `valid` is None for
            # interior blocks, else the number of valid rows in this block.
            if valid is not None:
                row_iota = lax.broadcasted_iota(jnp.int32, (chunk, LANES), 0)

            def body(g, acc):
                start = pl.multiple_of(g * chunk, chunk)
                p = p_ref[pl.ds(start, chunk), :].astype(jnp.float32)
                t = t_ref[pl.ds(start, chunk), :].astype(jnp.float32)
                d = jnp.abs(p - t)
                circ = jnp.minimum(d, 1.0 - d)
                if valid is not None:
                    circ = jnp.where(row_iota + start < valid, circ, 0.0)
                # (chunk,128) -> (chunk//8, 8, 128) -> (8, 128): pure
                # sublane-group VPU adds; the cross-lane reduce is deferred
                # to the wrapper.
                return acc + circ.reshape(-1, 8, LANES).sum(axis=0)

            return lax.fori_loop(0, groups, body,
                                 jnp.zeros((8, LANES), jnp.float32))

        is_interior = blk_idx < (num_blocks - 1)

        @pl.when(is_interior)
        def _():
            o_ref[...] += block_partial_sum(None)

        @pl.when(jnp.logical_not(is_interior))
        def _():
            # Last (possibly ragged) block of the slab, or a clamped overhang
            # step of a shard (valid == 0 -> contributes exactly 0).  The
            # mask is mandatory: out-of-bounds rows of an edge block read
            # unspecified data.
            valid = jnp.where(blk_idx == num_blocks - 1,
                              jnp.int32(valid_last), jnp.int32(0))
            o_ref[...] += block_partial_sum(valid)

    return kernel


def circular_loss(y_pred, y_true, *, block_bytes=4 << 20, num_shards=None):
    """mean(min(|y_pred - y_true|, 1 - |y_pred - y_true|)) as a Pallas TPU kernel."""
    assert y_pred.shape == y_true.shape, "y_pred / y_true shapes must match"
    total = int(y_pred.size)
    assert total > 0, "empty input"

    def as_float_stream(x):
        x = jnp.ravel(x)
        # Floats keep their native dtype in HBM (in-kernel upcast to f32);
        # integers are promoted to f32 in the wrapper.
        return x if jnp.issubdtype(x.dtype, jnp.floating) else x.astype(jnp.float32)

    flat_p = as_float_stream(y_pred)
    flat_t = as_float_stream(y_true)

    # ---- lane-dense (rows, 128) slabs -------------------------------------
    m = -(-total // LANES)                 # rows of 128 lanes
    lane_pad = m * LANES - total
    if lane_pad:
        # Only fires when numel % 128 != 0 (< 128 zero elements; each
        # contributes min(|0-0|, 1-0) = 0).  No block/shard round-up padding.
        flat_p = jnp.pad(flat_p, (0, lane_pad))
        flat_t = jnp.pad(flat_t, (0, lane_pad))
    p2 = flat_p.reshape(m, LANES)
    t2 = flat_t.reshape(m, LANES)

    # ---- tile sizes --------------------------------------------------------
    p_item = jnp.dtype(p2.dtype).itemsize
    t_item = jnp.dtype(t2.dtype).itemsize
    row_mult = {1: 32, 2: 16}.get(min(p_item, t_item), 8)   # sublane packing
    bytes_per_row = LANES * (p_item + t_item)
    # ~4 MiB of combined input per grid step => ~8-9 MiB double-buffered in
    # VMEM (e.g. 4096 rows for f32+f32, 8192 for bf16+bf16).
    target_rows = max(64, ((block_bytes // bytes_per_row) // 64) * 64)
    blk = min(target_rows, _round_up(m, row_mult))
    chunk = 8
    for cand in (64, 32, 16, 8):
        if blk % cand == 0:
            chunk = cand
            break

    num_blocks = -(-m // blk)
    valid_last = m - (num_blocks - 1) * blk

    if num_shards is None:
        num_shards = _num_tensorcores()
    num_shards = max(1, min(num_shards, num_blocks))
    blocks_per_shard = -(-num_blocks // num_shards)

    # Clamp overhang steps of the last shard onto the last real block; the
    # kernel masks their contribution to zero (<= num_shards-1 wasted blocks).
    in_map = lambda s, i: (jnp.minimum(s * blocks_per_shard + i, num_blocks - 1), 0)
    out_map = lambda s, i: (s, 0)

    kernel = _make_kernel(blk, chunk, blocks_per_shard, num_blocks, valid_last)

    partial = pl.pallas_call(
        kernel,
        out_shape=jax.ShapeDtypeStruct((num_shards * 8, LANES), jnp.float32),
        grid_spec=pltpu.PrefetchScalarGridSpec(
            num_scalar_prefetch=0,
            grid=(num_shards, blocks_per_shard),
            in_specs=[
                pl.BlockSpec((blk, LANES), in_map),
                pl.BlockSpec((blk, LANES), in_map),
            ],
            out_specs=pl.BlockSpec((8, LANES), out_map),
        ),
        compiler_params=pltpu.CompilerParams(
            # Shard axis "parallel" (megacore split on 2-TC chips); streaming
            # reduction axis "arbitrary".
            dimension_semantics=("parallel", "arbitrary"),
            vmem_limit_bytes=32 * 1024 * 1024,
        ),
    )(p2, t2)

    # Tiny final cross-lane reduce + mean over the ORIGINAL element count.
    return jnp.sum(partial) / jnp.float32(total)


if __name__ == "__main__":
    key = jax.random.PRNGKey(0)
    k1, k2, k3, k4 = jax.random.split(key, 4)

    def ref_loss(p, t):
        d = jnp.abs(p.astype(jnp.float32) - t.astype(jnp.float32))
        return jnp.mean(jnp.minimum(d, 1.0 - d))

    # Phase maps in [0, 1), small NCHW-like shape (lane-aligned case).
    y_pred = jax.random.uniform(k1, (2, 4, 16, 16), dtype=jnp.float32)
    y_true = jax.random.uniform(k2, (2, 4, 16, 16), dtype=jnp.float32)
    loss = circular_loss(y_pred, y_true)
    jax.block_until_ready(loss)
    assert jnp.allclose(loss, ref_loss(y_pred, y_true), atol=1e-6, rtol=1e-5), (
        loss, ref_loss(y_pred, y_true))

    # Ragged case: numel not a multiple of 128 -> exercises the lane pad and
    # the in-kernel edge-block row mask.
    yp2 = jax.random.uniform(k3, (3, 5, 7), dtype=jnp.float32)
    yt2 = jax.random.uniform(k4, (3, 5, 7), dtype=jnp.float32)
    loss2 = circular_loss(yp2, yt2)
    jax.block_until_ready(loss2)
    assert jnp.allclose(loss2, ref_loss(yp2, yt2), atol=1e-6, rtol=1e-5), (
        loss2, ref_loss(yp2, yt2))

    print("KERNEL_OK")
</pallas_src>

<mosaic_0001>
module attributes {stable_mosaic.version = 11 : i64} {
  func.func @kernel(%arg0: i32, %arg1: i32, %arg2: memref<16x128xf32, #tpu.memory_space<vmem>>, %arg3: memref<16x128xf32, #tpu.memory_space<vmem>>, %arg4: memref<8x128xf32, #tpu.memory_space<vmem>>) attributes {dimension_semantics = [#tpu.dimension_semantics<parallel>, #tpu.dimension_semantics<arbitrary>], iteration_bounds = array<i64: 1, 1>, scalar_prefetch = 0 : i64, scratch_operands = 0 : i64, tpu.core_type = #tpu.core_type<tc>, window_params = [{transform_indices = @transform_0, window_bounds = array<i64: 16, 128>}, {transform_indices = @transform_1, window_bounds = array<i64: 16, 128>}, {transform_indices = @transform_2, window_bounds = array<i64: 8, 128>}]} {
    %c0_i32 = arith.constant 0 : i32
    %0 = arith.cmpi eq, %arg1, %c0_i32 : i32
    %1 = arith.extui %0 : i1 to i32
    %c0_i32_0 = arith.constant 0 : i32
    %2 = arith.cmpi ne, %1, %c0_i32_0 : i32
    scf.if %2 {
      %cst = arith.constant 0.000000e+00 : f32
      %11 = vector.broadcast %cst : f32 to vector<8x128xf32>
      %c0 = arith.constant 0 : index
      %c0_4 = arith.constant 0 : index
      %12 = vector.load %arg4[%c0, %c0_4] : memref<8x128xf32, #tpu.memory_space<vmem>>, vector<8x128xf32>
      tpu.vector_store %arg4[%c0, %c0_4], %11 {strides = array<i32>} : memref<8x128xf32, #tpu.memory_space<vmem>>, vector<8x128xf32>,
    } else {
    }
    %c1_i32 = arith.constant 1 : i32
    %3 = arith.muli %arg0, %c1_i32 : i32
    %4 = arith.addi %3, %arg1 : i32
    %c0_i32_1 = arith.constant 0 : i32
    %5 = arith.cmpi slt, %4, %c0_i32_1 : i32
    %6 = arith.extui %5 : i1 to i32
    %c0_i32_2 = arith.constant 0 : i32
    %7 = arith.cmpi ne, %6, %c0_i32_2 : i32
    scf.if %7 {
      %c0 = arith.constant 0 : index
      %c0_4 = arith.constant 0 : index
      %11 = vector.load %arg4[%c0, %c0_4] : memref<8x128xf32, #tpu.memory_space<vmem>>, vector<8x128xf32>
      %cst = arith.constant 0.000000e+00 : f32
      %12 = vector.broadcast %cst : f32 to vector<8x128xf32>
      %c0_i32_5 = arith.constant 0 : i32
      %c16_i32 = arith.constant 16 : i32
      %13 = arith.muli %c0_i32_5, %c16_i32 : i32
      %14 = tpu.assume_multiple %13, 16 : i32
      %15 = arith.index_cast %14 : i32 to index
      %c0_6 = arith.constant 0 : index
      %16 = vector.load %arg2[%15, %c0_6] : memref<16x128xf32, #tpu.memory_space<vmem>>, vector<16x128xf32>
      %17 = arith.index_cast %14 : i32 to index
      %c0_7 = arith.constant 0 : index
      %18 = vector.load %arg3[%17, %c0_7] : memref<16x128xf32, #tpu.memory_space<vmem>>, vector<16x128xf32>
      %19 = arith.subf %16, %18 : vector<16x128xf32>
      %20 = math.absf %19 : vector<16x128xf32>
      %cst_8 = arith.constant 1.000000e+00 : f32
      %21 = vector.broadcast %cst_8 : f32 to vector<16x128xf32>
      %22 = arith.subf %21, %20 : vector<16x128xf32>
      %23 = arith.minimumf %20, %22 : vector<16x128xf32>
      %24 = vector.shape_cast %23 : vector<16x128xf32> to vector<2x8x128xf32>
      %cst_9 = arith.constant dense<0.000000e+00> : vector<8x128xf32>
      %25 = vector.multi_reduction <add>, %24, %cst_9 [0] : vector<2x8x128xf32> to vector<8x128xf32>
      %26 = arith.addf %12, %25 : vector<8x128xf32>
      %c1_i32_10 = arith.constant 1 : i32
      %27 = arith.addf %11, %26 : vector<8x128xf32>
      %c0_11 = arith.constant 0 : index
      %c0_12 = arith.constant 0 : index
      %28 = vector.load %arg4[%c0_11, %c0_12] : memref<8x128xf32, #tpu.memory_space<vmem>>, vector<8x128xf32>
      tpu.vector_store %arg4[%c0_11, %c0_12], %27 {strides = array<i32>} : memref<8x128xf32, #tpu.memory_space<vmem>>, vector<8x128xf32>,
    } else {
    }
    %true = arith.constant true
    %8 = arith.xori %5, %true : i1
    %9 = arith.extui %8 : i1 to i32
    %c0_i32_3 = arith.constant 0 : i32
    %10 = arith.cmpi ne, %9, %c0_i32_3 : i32
    scf.if %10 {
      %c0_i32_4 = arith.constant 0 : i32
      %11 = arith.cmpi eq, %4, %c0_i32_4 : i32
      %c16_i32 = arith.constant 16 : i32
      %c0_i32_5 = arith.constant 0 : i32
      %12 = arith.select %11, %c16_i32, %c0_i32_5 : i32
      %c0 = arith.constant 0 : index
      %c0_6 = arith.constant 0 : index
      %13 = vector.load %arg4[%c0, %c0_6] : memref<8x128xf32, #tpu.memory_space<vmem>>, vector<8x128xf32>
      %14 = tpu.iota {dimensions = array<i32: 0>} : vector<16x128xi32>
      %cst = arith.constant 0.000000e+00 : f32
      %15 = vector.broadcast %cst : f32 to vector<8x128xf32>
      %c0_i32_7 = arith.constant 0 : i32
      %c16_i32_8 = arith.constant 16 : i32
      %16 = arith.muli %c0_i32_7, %c16_i32_8 : i32
      %17 = tpu.assume_multiple %16, 16 : i32
      %18 = arith.index_cast %17 : i32 to index
      %c0_9 = arith.constant 0 : index
      %19 = vector.load %arg2[%18, %c0_9] : memref<16x128xf32, #tpu.memory_space<vmem>>, vector<16x128xf32>
      %20 = arith.index_cast %17 : i32 to index
      %c0_10 = arith.constant 0 : index
      %21 = vector.load %arg3[%20, %c0_10] : memref<16x128xf32, #tpu.memory_space<vmem>>, vector<16x128xf32>
      %22 = arith.subf %19, %21 : vector<16x128xf32>
      %23 = math.absf %22 : vector<16x128xf32>
      %cst_11 = arith.constant 1.000000e+00 : f32
      %24 = vector.broadcast %cst_11 : f32 to vector<16x128xf32>
      %25 = arith.subf %24, %23 : vector<16x128xf32>
      %26 = arith.minimumf %23, %25 : vector<16x128xf32>
      %27 = vector.broadcast %17 : i32 to vector<16x128xi32>
      %28 = arith.addi %14, %27 : vector<16x128xi32>
      %29 = vector.broadcast %12 : i32 to vector<16x128xi32>
      %30 = arith.cmpi slt, %28, %29 : vector<16x128xi32>
      %cst_12 = arith.constant 0.000000e+00 : f32
      %31 = vector.broadcast %cst_12 : f32 to vector<16x128xf32>
      %32 = arith.select %30, %26, %31 : vector<16x128xi1>, vector<16x128xf32>
      %33 = vector.shape_cast %32 : vector<16x128xf32> to vector<2x8x128xf32>
      %cst_13 = arith.constant dense<0.000000e+00> : vector<8x128xf32>
      %34 = vector.multi_reduction <add>, %33, %cst_13 [0] : vector<2x8x128xf32> to vector<8x128xf32>
      %35 = arith.addf %15, %34 : vector<8x128xf32>
      %c1_i32_14 = arith.constant 1 : i32
      %36 = arith.addf %13, %35 : vector<8x128xf32>
      %c0_15 = arith.constant 0 : index
      %c0_16 = arith.constant 0 : index
      %37 = vector.load %arg4[%c0_15, %c0_16] : memref<8x128xf32, #tpu.memory_space<vmem>>, vector<8x128xf32>
      tpu.vector_store %arg4[%c0_15, %c0_16], %36 {strides = array<i32>} : memref<8x128xf32, #tpu.memory_space<vmem>>, vector<8x128xf32>,
    } else {
    }
    return
  }
  func.func @transform_0(%arg0: i32, %arg1: i32) -> (i32, i32) {
    %c1_i32 = arith.constant 1 : i32
    %0 = arith.muli %arg0, %c1_i32 : i32
    %1 = arith.addi %0, %arg1 : i32
    %c0_i32 = arith.constant 0 : i32
    %2 = arith.minsi %1, %c0_i32 : i32
    %c0_i32_0 = arith.constant 0 : i32
    %c0_i32_1 = arith.constant 0 : i32
    return %2, %c0_i32_0 : i32, i32
  }
  func.func @transform_1(%arg0: i32, %arg1: i32) -> (i32, i32) {
    %c1_i32 = arith.constant 1 : i32
    %0 = arith.muli %arg0, %c1_i32 : i32
    %1 = arith.addi %0, %arg1 : i32
    %c0_i32 = arith.constant 0 : i32
    %2 = arith.minsi %1, %c0_i32 : i32
    %c0_i32_0 = arith.constant 0 : i32
    %c0_i32_1 = arith.constant 0 : i32
    return %2, %c0_i32_0 : i32, i32
  }
  func.func @transform_2(%arg0: i32, %arg1: i32) -> (i32, i32) {
    %c0_i32 = arith.constant 0 : i32
    %c0_i32_0 = arith.constant 0 : i32
    return %arg0, %c0_i32 : i32, i32
  }
}

</mosaic_0001>

<bundles_post_ra>
// kernel: tpu_custom_call.1
= control target key start
LH: loop header
LB: loop body
LE: loop exit
PB: predicated region body
PF: predicated region fallthrough
CT: control target
= control target key end

     0   :  { %7 = vsyncpa [#allocation3], 0  ;;  %s275_s0 = inlined_call_operand.hbm [shape: f32[16,128], index: 0, kind: input, shape index: {}]   ;;  %s276_s1 = inlined_call_operand.hbm [shape: f32[16,128], index: 1, kind: input, shape index: {}]   ;;  %s277_s2 = inlined_call_operand.hbm [shape: f32[8,128], index: 2, kind: output, shape index: {}]  }
   0x1   :  { %8 = vsyncpa [#allocation6], 0 }
   0x2   :  { %9 = vsyncpa [#allocation4], 0  ;;  %s219_s9 = smov [#allocation2]   ;;  %s147_s13 = scalar_lea.hbm %s275_s0, 256 }
   0x3   :  { %s21_s10 = sshll.u32 %s219_s9, 4  ;;  %p148_p0 = scmp.ne.s32.totalorder %s275_s0, %s147_s13  ;;  %s22_s10 = int_to_ptr.vmem [resolvable:$true] %s21_s10 }
   0x4   :  { %p151_p1 = scmp.lt.u32.totalorder %s147_s13, %s275_s0 }
   0x6   :  { %p153_p2 = pnand %p151_p1, %p148_p0 }
   0x8   :  { %156 = shalt.err (!%p153_p2)
}
   0x9   :  { %s157_s18 = scalar_lea.vmem %s22_s10, 256  ;;  %p162_p4 = scmp.lt.s32.totalorder %s22_s10, %s22_s10 }
   0xa   :  { %p158_p3 = scmp.ne.s32.totalorder %s22_s10, %s157_s18  ;;  %p163_p5 = scmp.lt.s32.totalorder %s157_s18, %s157_s18 }
   0xc   :  { %p164_p6 = por %p163_p5, %p162_p4 }
   0xe   :  { %p165_p7 = pnand %p164_p6, %p158_p3 }
  0x10   :  { %168 = shalt.err (!%p165_p7)
}
  0x11   :  { %s220_s19 = smov 128   ;;  %s221_s20 = smov 8  }
  0x12   :  { %27 = dma.hbm_to_vmem [thread:$0]  %s275_s0, 256, %s22_s10, [#allocation3], %s220_s19, %s220_s19, %s221_s20  }
  0x13   :  { %s222_s23 = smov [#allocation5]   ;;  %s169_s27 = scalar_lea.hbm %s276_s1, 256 }
  0x14   :  { %s39_s24 = sshll.u32 %s222_s23, 4  ;;  %p170_p8 = scmp.ne.s32.totalorder %s276_s1, %s169_s27  ;;  %s40_s24 = int_to_ptr.vmem [resolvable:$true] %s39_s24 }
  0x15   :  { %p173_p9 = scmp.lt.u32.totalorder %s169_s27, %s276_s1 }
  0x17   :  { %p175_p10 = pnand %p173_p9, %p170_p8 }
  0x19   :  { %178 = shalt.err (!%p175_p10)
}
  0x1a   :  { %s179_s4 = scalar_lea.vmem %s40_s24, 256  ;;  %p184_p12 = scmp.lt.s32.totalorder %s40_s24, %s40_s24 }
  0x1b   :  { %p180_p11 = scmp.ne.s32.totalorder %s40_s24, %s179_s4  ;;  %p185_p13 = scmp.lt.s32.totalorder %s179_s4, %s179_s4 }
  0x1d   :  { %p186_p0 = por %p185_p13, %p184_p12 }
  0x1f   :  { %p187_p1 = pnand %p186_p0, %p180_p11 }
  0x21   :  { %190 = shalt.err (!%p187_p1)
}
  0x22   :  { %45 = dma.hbm_to_vmem [thread:$0]  %s276_s1, 256, %s40_s24, [#allocation6], %s220_s19, %s220_s19, %s221_s20  }
  0x23   :  { %213 = dma.done.wait [#allocation3], 256  }
  0x24   :  { %214 = vsyncadd [#allocation3], 4294967040 }
  0x25   :  { %215 = dma.done.wait [#allocation6], 256  }
  0x26   :  { %216 = vsyncadd [#allocation6], 4294967040  ;;  %v97_v0 = vld [vmem:[#allocation2] sm:$0xff]  ;;  %v98_v1 = vld [vmem:[#allocation2 + $0x8] sm:$0xff]  ;;  %s223_s6 = smov [#allocation7]  }
  0x27   :  { %v99_v2 = vld [vmem:[#allocation5] sm:$0xff]  ;;  %v100_v3 = vld [vmem:[#allocation5 + $0x8] sm:$0xff]  ;;  %s127_s7 = sshll.u32 %s223_s6, 4  ;;  %s128_s7 = int_to_ptr.vmem [resolvable:$true] %s127_s7 }
  0x28   :  { %v101_v4 = vsub.f32 %v97_v0, %v99_v2  ;;  %v102_v5 = vsub.f32 %v98_v1, %v100_v3  ;;  %s191_s1 = scalar_lea.vmem %s128_s7, 128  ;;  %p196_p3 = scmp.lt.s32.totalorder %s128_s7, %s128_s7 }
  0x29   :  { %p192_p2 = scmp.ne.s32.totalorder %s128_s7, %s191_s1  ;;  %p197_p4 = scmp.lt.s32.totalorder %s191_s1, %s191_s1 }
  0x2a   :  { %v103_v6 = vand.u32 2147483647, %v101_v4  ;;  %v104_v7 = vand.u32 2147483647, %v102_v5 }
  0x2b   :  { %p198_p5 = por %p197_p4, %p196_p3 }
  0x2c   :  { %v105_v8 = vsub.f32 1.0, %v103_v6  ;;  %v106_v9 = vsub.f32 1.0, %v104_v7 }
  0x2d   :  { %p199_p6 = pnand %p198_p5, %p192_p2 }
  0x2e   :  { %v107_v10 = vmin.f32 %v103_v6, %v105_v8  ;;  %v108_v11 = vmin.f32 %v104_v7, %v106_v9 }
  0x30   :  { %v117_v12 = vadd.f32 %v108_v11, %v107_v10 }
  0x32   :  { %120 = vst [vmem:[#allocation7] sm:$0xff] %v117_v12 }
  0x33   :  { %202 = shalt.err (!%p199_p6)
}
  0x34   :  { %s203_s10 = scalar_lea.hbm %s277_s2, 128 }
  0x35   :  { %p204_p7 = scmp.ne.s32.totalorder %s277_s2, %s203_s10  ;;  %p207_p8 = scmp.lt.u32.totalorder %s203_s10, %s277_s2 }
  0x37   :  { %p209_p9 = pnand %p207_p8, %p204_p7 }
  0x39   :  { %212 = shalt.err (!%p209_p9)
}
  0x3a   :  { %130 = dma.vmem_to_hbm [thread:$0]  %s128_s7, 128, %s277_s2, [#allocation4]  }
  0x3b   :  { %217 = dma.done.wait [#allocation4], 128  }
  0x3c   :  { %218 = vsyncadd [#allocation4], 4294967168 }
  0x3d   :  { %134 = vsyncpa [#allocation3], 1 }
  0x3e   :  { %135 = vsyncpa [#allocation6], 1 }
  0x3f   :  { %136 = vsyncpa [#allocation4], 1 }

</bundles_post_ra>
